<compile_context>
chip_gen: v5e
topology: v5e:2x2
jax: 0.10.0
libtpu: 0.0.40
codegen_flags: <defaults>
</compile_context>

<pallas_src>
from functools import partial

import jax
import jax.numpy as jnp
from jax.experimental import pallas as pl
from jax.experimental.pallas import tpu as pltpu


# ----------------------------------------------------------------------------
# Kernel
# ----------------------------------------------------------------------------
def block_kernel(n_head,
                 x_ref,
                 wqkv_ref, bqkv_ref,
                 wp_ref, bp_ref,
                 w1_ref, b1_ref,
                 w2_ref, b2_ref,
                 o_ref):
    bt, T, D = x_ref.shape
    hd = D // n_head

    x = x_ref[...]                                    # (bt, T, D) f32
    xf = x.reshape(bt * T, D)                         # fat-M rows (free when T % 8 == 0)
    xb = xf.astype(jnp.bfloat16)

    # ---- Fused QKV projection: one full-width (D, 3D) MXU matmul.
    #      1/sqrt(hd) is already folded into the Q columns of wqkv/bqkv.
    qkv = jnp.dot(xb, wqkv_ref[...],
                  preferred_element_type=jnp.float32) + bqkv_ref[...]   # (bt*T, 3D) f32
    qkv3 = qkv.reshape(bt, T, 3 * D)

    # ---- Per-head attention (cheap per-head work only: scores + softmax + PV).
    heads = []
    for h in range(n_head):                           # static offsets -> static lane slices
        q = qkv3[..., h * hd:(h + 1) * hd].astype(jnp.bfloat16)
        k = qkv3[..., D + h * hd:D + (h + 1) * hd].astype(jnp.bfloat16)
        v = qkv3[..., 2 * D + h * hd:2 * D + (h + 1) * hd].astype(jnp.bfloat16)

        s = jnp.einsum("bqd,bkd->bqk", q, k,
                       preferred_element_type=jnp.float32)              # (bt, T, T)
        s_max = jnp.max(s, axis=-1, keepdims=True)
        p = jnp.exp(s - s_max)                        # f32 exp (v5e has no bf16 EUP)
        inv = pl.reciprocal(jnp.sum(p, axis=-1, keepdims=True), approx=True)
        o_h = jnp.einsum("bqk,bkd->bqd", p.astype(jnp.bfloat16), v,
                         preferred_element_type=jnp.float32)            # (bt, T, hd)
        # Deferred softmax normalization: scale the (T, hd) output, not the (T, T) probs.
        heads.append((o_h * inv).astype(jnp.bfloat16))

    # ---- Single full-K output projection (D, D) after the head loop.
    o_cat = jnp.concatenate(heads, axis=-1).reshape(bt * T, D)           # bf16
    attn = jnp.dot(o_cat, wp_ref[...],
                   preferred_element_type=jnp.float32) + bp_ref[...]

    x1 = xf + attn                                    # residual 1 (f32)

    # ---- MLP: Linear -> ReLU -> Linear
    h1 = jnp.dot(x1.astype(jnp.bfloat16), w1_ref[...],
                 preferred_element_type=jnp.float32) + b1_ref[...]
    h1 = jnp.maximum(h1, 0.0)
    mlp = jnp.dot(h1.astype(jnp.bfloat16), w2_ref[...],
                  preferred_element_type=jnp.float32) + b2_ref[...]

    o_ref[...] = (x1 + mlp).reshape(bt, T, D).astype(o_ref.dtype)        # residual 2


# ----------------------------------------------------------------------------
# Wrapper helpers
# ----------------------------------------------------------------------------
def _pick_batch_block(B, T, target_rows=512):
    """Batch-block size: smallest divisor of B reaching ~target_rows MXU rows,
    capped at B//2 so the grid has >= 2 steps (keeps both v7x TensorCores busy)."""
    bt_cap = max(1, B // 2)
    best = 1
    for d in range(1, bt_cap + 1):
        if B % d == 0:
            best = d
            if d * T >= target_rows:
                break
    return best


def _vmem_limit_bytes():
    """Advisory VMEM limit ~= 3/4 of physical capacity, capped.
    v7x (64 MiB/core) -> 48 MiB; v5e/v6e (128 MiB) -> 96 MiB."""
    cap = None
    if hasattr(pltpu, "get_tpu_info"):
        try:  # capacity probe only — never changes the kernel's memory configuration
            cap = getattr(pltpu.get_tpu_info(), "vmem_capacity_bytes", None)
        except Exception:
            cap = None
    if not cap:
        cap = 64 * 1024 * 1024            # conservative default: smallest (v7x) VMEM
    return int(min(cap * 3 // 4, 112 * 1024 * 1024))


def prepare_params(params, *, n_head, compute_dtype=jnp.bfloat16):
    """Fused, scale-folded, bf16 weights for the kernel.

    Column layout of w_qkv (D, 3D) matches the reference reshape (.., 3, H, hd):
    columns [0:D] are Q (all heads), [D:2D] K, [2D:3D] V; within each, head h
    occupies columns [h*hd:(h+1)*hd].  The 1/sqrt(hd) score scale is folded into
    the Q columns of both weight and bias.
    """
    D = params["w_proj"].shape[0]
    hd = D // n_head
    scale = 1.0 / (float(hd) ** 0.5)
    col_scale = jnp.concatenate([jnp.full((D,), scale, jnp.float32),
                                 jnp.ones((2 * D,), jnp.float32)])
    return {
        "wqkv": (params["w_qkv"] * col_scale[None, :]).astype(compute_dtype),
        "bqkv": (params["b_qkv"] * col_scale[None, :]).astype(jnp.float32),
        "wp": params["w_proj"].astype(compute_dtype),
        "bp": params["b_proj"].astype(jnp.float32),
        "w1": params["w1"].astype(compute_dtype),
        "b1": params["b1"].astype(jnp.float32),
        "w2": params["w2"].astype(compute_dtype),
        "b2": params["b2"].astype(jnp.float32),
    }


def block_forward(x, kparams, *, n_head, batch_block=None, alias_input=False):
    B, T, D = x.shape
    bt = batch_block or _pick_batch_block(B, T)
    assert B % bt == 0
    grid = (B // bt,)

    order = ["wqkv", "bqkv", "wp", "bp", "w1", "b1", "w2", "b2"]
    weights = [kparams[k] for k in order]

    # Grid-invariant operands: whole array resident in VMEM for the entire kernel
    # (single copy, no per-step double buffering).
    weight_specs = [pl.BlockSpec(memory_space=pltpu.MemorySpace.VMEM) for _ in weights]

    call = pl.pallas_call(
        partial(block_kernel, n_head),
        out_shape=jax.ShapeDtypeStruct((B, T, D), x.dtype),
        grid_spec=pltpu.PrefetchScalarGridSpec(
            num_scalar_prefetch=0,
            grid=grid,
            in_specs=[pl.BlockSpec((bt, T, D), lambda b: (b, 0, 0))] + weight_specs,
            out_specs=pl.BlockSpec((bt, T, D), lambda b: (b, 0, 0)),
        ),
        # alias_input=True reuses x's HBM buffer for the output (x must not be
        # read by the caller afterwards).
        input_output_aliases={0: 0} if alias_input else {},
        compiler_params=pltpu.CompilerParams(
            dimension_semantics=("parallel",),
            vmem_limit_bytes=_vmem_limit_bytes()),
    )
    return call(x, *weights)


# ----------------------------------------------------------------------------
# Params + pure-JAX reference (mirrors PyTorch Block.forward semantics)
# ----------------------------------------------------------------------------
def init_params(key, size, exp=4):
    ks = jax.random.split(key, 8)
    scale = 0.02
    return {
        # stored as (in, out) so the math is y = x @ W + b
        "w_qkv":  scale * jax.random.normal(ks[0], (size, 3 * size), jnp.float32),
        "b_qkv":  scale * jax.random.normal(ks[1], (1, 3 * size), jnp.float32),
        "w_proj": scale * jax.random.normal(ks[2], (size, size), jnp.float32),
        "b_proj": scale * jax.random.normal(ks[3], (1, size), jnp.float32),
        "w1":     scale * jax.random.normal(ks[4], (size, size * exp), jnp.float32),
        "b1":     scale * jax.random.normal(ks[5], (1, size * exp), jnp.float32),
        "w2":     scale * jax.random.normal(ks[6], (size * exp, size), jnp.float32),
        "b2":     scale * jax.random.normal(ks[7], (1, size), jnp.float32),
    }


def block_ref(x, params, *, n_head):
    B, T, D = x.shape
    hd = D // n_head
    discount = float(hd) ** 0.5
    qkv = x @ params["w_qkv"] + params["b_qkv"][0]
    qkv = qkv.reshape(B, T, 3, n_head, hd).transpose(2, 0, 3, 1, 4)
    q, k, v = qkv[0], qkv[1], qkv[2]
    s = jnp.einsum("bhqd,bhkd->bhqk", q, k) / discount
    p = jax.nn.softmax(s, axis=-1)
    o = jnp.einsum("bhqk,bhkd->bhqd", p, v)
    o = o.transpose(0, 2, 1, 3).reshape(B, T, D)
    attn_out = o @ params["w_proj"] + params["b_proj"][0]
    x1 = x + attn_out
    h1 = jnp.maximum(x1 @ params["w1"] + params["b1"][0], 0.0)
    mlp = h1 @ params["w2"] + params["b2"][0]
    return x1 + mlp


if __name__ == "__main__":
    B, T, D, n_head = 2, 8, 32, 4
    key = jax.random.PRNGKey(0)
    kx, kp = jax.random.split(key)
    x = jax.random.normal(kx, (B, T, D), jnp.float32)
    params = init_params(kp, D)

    kparams = prepare_params(params, n_head=n_head)
    out = jax.block_until_ready(block_forward(x, kparams, n_head=n_head))

    ref = block_ref(x, params, n_head=n_head)
    assert out.shape == (B, T, D)
    max_err = float(jnp.max(jnp.abs(out - ref)))
    # bf16 matmul inputs + approx softmax reciprocal -> loosened tolerance.
    assert jnp.allclose(out, ref, atol=2e-2, rtol=2e-2), max_err
    print("KERNEL_OK")
</pallas_src>

<mosaic_0001>
module attributes {stable_mosaic.version = 11 : i64} {
  func.func @block_kernel(%arg0: i32, %arg1: memref<1x8x32xf32, #tpu.memory_space<vmem>>, %arg2: memref<32x96xbf16, #tpu.memory_space<vmem>>, %arg3: memref<1x96xf32, #tpu.memory_space<vmem>>, %arg4: memref<32x32xbf16, #tpu.memory_space<vmem>>, %arg5: memref<1x32xf32, #tpu.memory_space<vmem>>, %arg6: memref<32x128xbf16, #tpu.memory_space<vmem>>, %arg7: memref<1x128xf32, #tpu.memory_space<vmem>>, %arg8: memref<128x32xbf16, #tpu.memory_space<vmem>>, %arg9: memref<1x32xf32, #tpu.memory_space<vmem>>, %arg10: memref<1x8x32xf32, #tpu.memory_space<vmem>>) attributes {dimension_semantics = [#tpu.dimension_semantics<parallel>], iteration_bounds = array<i64: 2>, scalar_prefetch = 0 : i64, scratch_operands = 0 : i64, tpu.core_type = #tpu.core_type<tc>, window_params = [{transform_indices = @transform_0, window_bounds = array<i64: 1, 8, 32>}, {pipeline_mode = #tpu.pipeline_mode<synchronous>, transform_indices = @transform_1, window_bounds = array<i64: 32, 96>}, {pipeline_mode = #tpu.pipeline_mode<synchronous>, transform_indices = @transform_2, window_bounds = array<i64: 1, 96>}, {pipeline_mode = #tpu.pipeline_mode<synchronous>, transform_indices = @transform_3, window_bounds = array<i64: 32, 32>}, {pipeline_mode = #tpu.pipeline_mode<synchronous>, transform_indices = @transform_4, window_bounds = array<i64: 1, 32>}, {pipeline_mode = #tpu.pipeline_mode<synchronous>, transform_indices = @transform_5, window_bounds = array<i64: 32, 128>}, {pipeline_mode = #tpu.pipeline_mode<synchronous>, transform_indices = @transform_6, window_bounds = array<i64: 1, 128>}, {pipeline_mode = #tpu.pipeline_mode<synchronous>, transform_indices = @transform_7, window_bounds = array<i64: 128, 32>}, {pipeline_mode = #tpu.pipeline_mode<synchronous>, transform_indices = @transform_8, window_bounds = array<i64: 1, 32>}, {transform_indices = @transform_9, window_bounds = array<i64: 1, 8, 32>}]} {
    %c0 = arith.constant 0 : index
    %c0_0 = arith.constant 0 : index
    %c0_1 = arith.constant 0 : index
    %0 = vector.load %arg1[%c0, %c0_0, %c0_1] : memref<1x8x32xf32, #tpu.memory_space<vmem>>, vector<1x8x32xf32>
    %1 = vector.shape_cast %0 : vector<1x8x32xf32> to vector<8x32xf32>
    %2 = arith.truncf %1 : vector<8x32xf32> to vector<8x32xbf16>
    %c0_2 = arith.constant 0 : index
    %c0_3 = arith.constant 0 : index
    %3 = vector.load %arg2[%c0_2, %c0_3] : memref<32x96xbf16, #tpu.memory_space<vmem>>, vector<32x96xbf16>
    %cst = arith.constant dense<0.000000e+00> : vector<8x96xf32>
    %4 = tpu.matmul %2, %3, %cst {dimension_numbers = #tpu.dot_dimension_numbers<[1], [0], [0], [1], [0, 0, 1, 1], [], []>} : vector<8x32xbf16>, vector<32x96xbf16>, vector<8x96xf32> -> vector<8x96xf32>
    %c0_4 = arith.constant 0 : index
    %c0_5 = arith.constant 0 : index
    %5 = vector.load %arg3[%c0_4, %c0_5] : memref<1x96xf32, #tpu.memory_space<vmem>>, vector<1x96xf32>
    %6 = vector.broadcast %5 : vector<1x96xf32> to vector<8x96xf32>
    %7 = arith.addf %4, %6 : vector<8x96xf32>
    %8 = vector.shape_cast %7 : vector<8x96xf32> to vector<1x8x96xf32>
    %9 = vector.extract_strided_slice %8 {offsets = [0, 0, 0], sizes = [1, 8, 8], strides = [1, 1, 1]} : vector<1x8x96xf32> to vector<1x8x8xf32>
    %10 = arith.truncf %9 : vector<1x8x8xf32> to vector<1x8x8xbf16>
    %11 = vector.extract_strided_slice %8 {offsets = [0, 0, 32], sizes = [1, 8, 8], strides = [1, 1, 1]} : vector<1x8x96xf32> to vector<1x8x8xf32>
    %12 = arith.truncf %11 : vector<1x8x8xf32> to vector<1x8x8xbf16>
    %13 = vector.extract_strided_slice %8 {offsets = [0, 0, 64], sizes = [1, 8, 8], strides = [1, 1, 1]} : vector<1x8x96xf32> to vector<1x8x8xf32>
    %14 = arith.truncf %13 : vector<1x8x8xf32> to vector<1x8x8xbf16>
    "tpu.trace_start"() <{level = 10 : i32, message = "bqd,bkd->bqk"}> : () -> ()
    %cst_6 = arith.constant dense<0.000000e+00> : vector<1x8x8xf32>
    %15 = tpu.matmul %10, %12, %cst_6 {dimension_numbers = #tpu.dot_dimension_numbers<[2], [2], [1], [1], [0, 0, 0, 1, 1, 1], [0], [0]>} : vector<1x8x8xbf16>, vector<1x8x8xbf16>, vector<1x8x8xf32> -> vector<1x8x8xf32>
    "tpu.trace_stop"() : () -> ()
    %cst_7 = arith.constant dense<0xFF800000> : vector<1x8xf32>
    %16 = vector.multi_reduction <maximumf>, %15, %cst_7 [2] : vector<1x8x8xf32> to vector<1x8xf32>
    %17 = vector.shape_cast %16 : vector<1x8xf32> to vector<1x8x1xf32>
    %18 = vector.broadcast %17 : vector<1x8x1xf32> to vector<1x8x8xf32>
    %19 = arith.subf %15, %18 : vector<1x8x8xf32>
    %20 = math.exp %19 : vector<1x8x8xf32>
    %cst_8 = arith.constant dense<0.000000e+00> : vector<1x8xf32>
    %21 = vector.multi_reduction <add>, %20, %cst_8 [2] : vector<1x8x8xf32> to vector<1x8xf32>
    %22 = vector.shape_cast %21 : vector<1x8xf32> to vector<1x8x1xf32>
    %23 = tpu.reciprocal %22 {approx = true} : vector<1x8x1xf32> -> vector<1x8x1xf32>
    %24 = arith.truncf %20 : vector<1x8x8xf32> to vector<1x8x8xbf16>
    "tpu.trace_start"() <{level = 10 : i32, message = "bqk,bkd->bqd"}> : () -> ()
    %cst_9 = arith.constant dense<0.000000e+00> : vector<1x8x8xf32>
    %25 = tpu.matmul %24, %14, %cst_9 {dimension_numbers = #tpu.dot_dimension_numbers<[2], [1], [1], [2], [0, 0, 0, 1, 1, 2], [0], [0]>} : vector<1x8x8xbf16>, vector<1x8x8xbf16>, vector<1x8x8xf32> -> vector<1x8x8xf32>
    "tpu.trace_stop"() : () -> ()
    %26 = vector.broadcast %23 : vector<1x8x1xf32> to vector<1x8x8xf32>
    %27 = arith.mulf %25, %26 : vector<1x8x8xf32>
    %28 = arith.truncf %27 : vector<1x8x8xf32> to vector<1x8x8xbf16>
    %29 = vector.extract_strided_slice %8 {offsets = [0, 0, 8], sizes = [1, 8, 8], strides = [1, 1, 1]} : vector<1x8x96xf32> to vector<1x8x8xf32>
    %30 = arith.truncf %29 : vector<1x8x8xf32> to vector<1x8x8xbf16>
    %31 = vector.extract_strided_slice %8 {offsets = [0, 0, 40], sizes = [1, 8, 8], strides = [1, 1, 1]} : vector<1x8x96xf32> to vector<1x8x8xf32>
    %32 = arith.truncf %31 : vector<1x8x8xf32> to vector<1x8x8xbf16>
    %33 = vector.extract_strided_slice %8 {offsets = [0, 0, 72], sizes = [1, 8, 8], strides = [1, 1, 1]} : vector<1x8x96xf32> to vector<1x8x8xf32>
    %34 = arith.truncf %33 : vector<1x8x8xf32> to vector<1x8x8xbf16>
    "tpu.trace_start"() <{level = 10 : i32, message = "bqd,bkd->bqk"}> : () -> ()
    %cst_10 = arith.constant dense<0.000000e+00> : vector<1x8x8xf32>
    %35 = tpu.matmul %30, %32, %cst_10 {dimension_numbers = #tpu.dot_dimension_numbers<[2], [2], [1], [1], [0, 0, 0, 1, 1, 1], [0], [0]>} : vector<1x8x8xbf16>, vector<1x8x8xbf16>, vector<1x8x8xf32> -> vector<1x8x8xf32>
    "tpu.trace_stop"() : () -> ()
    %cst_11 = arith.constant dense<0xFF800000> : vector<1x8xf32>
    %36 = vector.multi_reduction <maximumf>, %35, %cst_11 [2] : vector<1x8x8xf32> to vector<1x8xf32>
    %37 = vector.shape_cast %36 : vector<1x8xf32> to vector<1x8x1xf32>
    %38 = vector.broadcast %37 : vector<1x8x1xf32> to vector<1x8x8xf32>
    %39 = arith.subf %35, %38 : vector<1x8x8xf32>
    %40 = math.exp %39 : vector<1x8x8xf32>
    %cst_12 = arith.constant dense<0.000000e+00> : vector<1x8xf32>
    %41 = vector.multi_reduction <add>, %40, %cst_12 [2] : vector<1x8x8xf32> to vector<1x8xf32>
    %42 = vector.shape_cast %41 : vector<1x8xf32> to vector<1x8x1xf32>
    %43 = tpu.reciprocal %42 {approx = true} : vector<1x8x1xf32> -> vector<1x8x1xf32>
    %44 = arith.truncf %40 : vector<1x8x8xf32> to vector<1x8x8xbf16>
    "tpu.trace_start"() <{level = 10 : i32, message = "bqk,bkd->bqd"}> : () -> ()
    %cst_13 = arith.constant dense<0.000000e+00> : vector<1x8x8xf32>
    %45 = tpu.matmul %44, %34, %cst_13 {dimension_numbers = #tpu.dot_dimension_numbers<[2], [1], [1], [2], [0, 0, 0, 1, 1, 2], [0], [0]>} : vector<1x8x8xbf16>, vector<1x8x8xbf16>, vector<1x8x8xf32> -> vector<1x8x8xf32>
    "tpu.trace_stop"() : () -> ()
    %46 = vector.broadcast %43 : vector<1x8x1xf32> to vector<1x8x8xf32>
    %47 = arith.mulf %45, %46 : vector<1x8x8xf32>
    %48 = arith.truncf %47 : vector<1x8x8xf32> to vector<1x8x8xbf16>
    %49 = vector.extract_strided_slice %8 {offsets = [0, 0, 16], sizes = [1, 8, 8], strides = [1, 1, 1]} : vector<1x8x96xf32> to vector<1x8x8xf32>
    %50 = arith.truncf %49 : vector<1x8x8xf32> to vector<1x8x8xbf16>
    %51 = vector.extract_strided_slice %8 {offsets = [0, 0, 48], sizes = [1, 8, 8], strides = [1, 1, 1]} : vector<1x8x96xf32> to vector<1x8x8xf32>
    %52 = arith.truncf %51 : vector<1x8x8xf32> to vector<1x8x8xbf16>
    %53 = vector.extract_strided_slice %8 {offsets = [0, 0, 80], sizes = [1, 8, 8], strides = [1, 1, 1]} : vector<1x8x96xf32> to vector<1x8x8xf32>
    %54 = arith.truncf %53 : vector<1x8x8xf32> to vector<1x8x8xbf16>
    "tpu.trace_start"() <{level = 10 : i32, message = "bqd,bkd->bqk"}> : () -> ()
    %cst_14 = arith.constant dense<0.000000e+00> : vector<1x8x8xf32>
    %55 = tpu.matmul %50, %52, %cst_14 {dimension_numbers = #tpu.dot_dimension_numbers<[2], [2], [1], [1], [0, 0, 0, 1, 1, 1], [0], [0]>} : vector<1x8x8xbf16>, vector<1x8x8xbf16>, vector<1x8x8xf32> -> vector<1x8x8xf32>
    "tpu.trace_stop"() : () -> ()
    %cst_15 = arith.constant dense<0xFF800000> : vector<1x8xf32>
    %56 = vector.multi_reduction <maximumf>, %55, %cst_15 [2] : vector<1x8x8xf32> to vector<1x8xf32>
    %57 = vector.shape_cast %56 : vector<1x8xf32> to vector<1x8x1xf32>
    %58 = vector.broadcast %57 : vector<1x8x1xf32> to vector<1x8x8xf32>
    %59 = arith.subf %55, %58 : vector<1x8x8xf32>
    %60 = math.exp %59 : vector<1x8x8xf32>
    %cst_16 = arith.constant dense<0.000000e+00> : vector<1x8xf32>
    %61 = vector.multi_reduction <add>, %60, %cst_16 [2] : vector<1x8x8xf32> to vector<1x8xf32>
    %62 = vector.shape_cast %61 : vector<1x8xf32> to vector<1x8x1xf32>
    %63 = tpu.reciprocal %62 {approx = true} : vector<1x8x1xf32> -> vector<1x8x1xf32>
    %64 = arith.truncf %60 : vector<1x8x8xf32> to vector<1x8x8xbf16>
    "tpu.trace_start"() <{level = 10 : i32, message = "bqk,bkd->bqd"}> : () -> ()
    %cst_17 = arith.constant dense<0.000000e+00> : vector<1x8x8xf32>
    %65 = tpu.matmul %64, %54, %cst_17 {dimension_numbers = #tpu.dot_dimension_numbers<[2], [1], [1], [2], [0, 0, 0, 1, 1, 2], [0], [0]>} : vector<1x8x8xbf16>, vector<1x8x8xbf16>, vector<1x8x8xf32> -> vector<1x8x8xf32>
    "tpu.trace_stop"() : () -> ()
    %66 = vector.broadcast %63 : vector<1x8x1xf32> to vector<1x8x8xf32>
    %67 = arith.mulf %65, %66 : vector<1x8x8xf32>
    %68 = arith.truncf %67 : vector<1x8x8xf32> to vector<1x8x8xbf16>
    %69 = vector.extract_strided_slice %8 {offsets = [0, 0, 24], sizes = [1, 8, 8], strides = [1, 1, 1]} : vector<1x8x96xf32> to vector<1x8x8xf32>
    %70 = arith.truncf %69 : vector<1x8x8xf32> to vector<1x8x8xbf16>
    %71 = vector.extract_strided_slice %8 {offsets = [0, 0, 56], sizes = [1, 8, 8], strides = [1, 1, 1]} : vector<1x8x96xf32> to vector<1x8x8xf32>
    %72 = arith.truncf %71 : vector<1x8x8xf32> to vector<1x8x8xbf16>
    %73 = vector.extract_strided_slice %8 {offsets = [0, 0, 88], sizes = [1, 8, 8], strides = [1, 1, 1]} : vector<1x8x96xf32> to vector<1x8x8xf32>
    %74 = arith.truncf %73 : vector<1x8x8xf32> to vector<1x8x8xbf16>
    "tpu.trace_start"() <{level = 10 : i32, message = "bqd,bkd->bqk"}> : () -> ()
    %cst_18 = arith.constant dense<0.000000e+00> : vector<1x8x8xf32>
    %75 = tpu.matmul %70, %72, %cst_18 {dimension_numbers = #tpu.dot_dimension_numbers<[2], [2], [1], [1], [0, 0, 0, 1, 1, 1], [0], [0]>} : vector<1x8x8xbf16>, vector<1x8x8xbf16>, vector<1x8x8xf32> -> vector<1x8x8xf32>
    "tpu.trace_stop"() : () -> ()
    %cst_19 = arith.constant dense<0xFF800000> : vector<1x8xf32>
    %76 = vector.multi_reduction <maximumf>, %75, %cst_19 [2] : vector<1x8x8xf32> to vector<1x8xf32>
    %77 = vector.shape_cast %76 : vector<1x8xf32> to vector<1x8x1xf32>
    %78 = vector.broadcast %77 : vector<1x8x1xf32> to vector<1x8x8xf32>
    %79 = arith.subf %75, %78 : vector<1x8x8xf32>
    %80 = math.exp %79 : vector<1x8x8xf32>
    %cst_20 = arith.constant dense<0.000000e+00> : vector<1x8xf32>
    %81 = vector.multi_reduction <add>, %80, %cst_20 [2] : vector<1x8x8xf32> to vector<1x8xf32>
    %82 = vector.shape_cast %81 : vector<1x8xf32> to vector<1x8x1xf32>
    %83 = tpu.reciprocal %82 {approx = true} : vector<1x8x1xf32> -> vector<1x8x1xf32>
    %84 = arith.truncf %80 : vector<1x8x8xf32> to vector<1x8x8xbf16>
    "tpu.trace_start"() <{level = 10 : i32, message = "bqk,bkd->bqd"}> : () -> ()
    %cst_21 = arith.constant dense<0.000000e+00> : vector<1x8x8xf32>
    %85 = tpu.matmul %84, %74, %cst_21 {dimension_numbers = #tpu.dot_dimension_numbers<[2], [1], [1], [2], [0, 0, 0, 1, 1, 2], [0], [0]>} : vector<1x8x8xbf16>, vector<1x8x8xbf16>, vector<1x8x8xf32> -> vector<1x8x8xf32>
    "tpu.trace_stop"() : () -> ()
    %86 = vector.broadcast %83 : vector<1x8x1xf32> to vector<1x8x8xf32>
    %87 = arith.mulf %85, %86 : vector<1x8x8xf32>
    %88 = arith.truncf %87 : vector<1x8x8xf32> to vector<1x8x8xbf16>
    %89 = tpu.concatenate %28, %48, %68, %88 in 2 : vector<1x8x8xbf16>, vector<1x8x8xbf16>, vector<1x8x8xbf16>, vector<1x8x8xbf16> -> vector<1x8x32xbf16>
    %90 = vector.shape_cast %89 : vector<1x8x32xbf16> to vector<8x32xbf16>
    %c0_22 = arith.constant 0 : index
    %c0_23 = arith.constant 0 : index
    %91 = vector.load %arg4[%c0_22, %c0_23] : memref<32x32xbf16, #tpu.memory_space<vmem>>, vector<32x32xbf16>
    %cst_24 = arith.constant dense<0.000000e+00> : vector<8x32xf32>
    %92 = tpu.matmul %90, %91, %cst_24 {dimension_numbers = #tpu.dot_dimension_numbers<[1], [0], [0], [1], [0, 0, 1, 1], [], []>} : vector<8x32xbf16>, vector<32x32xbf16>, vector<8x32xf32> -> vector<8x32xf32>
    %c0_25 = arith.constant 0 : index
    %c0_26 = arith.constant 0 : index
    %93 = vector.load %arg5[%c0_25, %c0_26] : memref<1x32xf32, #tpu.memory_space<vmem>>, vector<1x32xf32>
    %94 = vector.broadcast %93 : vector<1x32xf32> to vector<8x32xf32>
    %95 = arith.addf %92, %94 : vector<8x32xf32>
    %96 = arith.addf %1, %95 : vector<8x32xf32>
    %97 = arith.truncf %96 : vector<8x32xf32> to vector<8x32xbf16>
    %c0_27 = arith.constant 0 : index
    %c0_28 = arith.constant 0 : index
    %98 = vector.load %arg6[%c0_27, %c0_28] : memref<32x128xbf16, #tpu.memory_space<vmem>>, vector<32x128xbf16>
    %cst_29 = arith.constant dense<0.000000e+00> : vector<8x128xf32>
    %99 = tpu.matmul %97, %98, %cst_29 {dimension_numbers = #tpu.dot_dimension_numbers<[1], [0], [0], [1], [0, 0, 1, 1], [], []>} : vector<8x32xbf16>, vector<32x128xbf16>, vector<8x128xf32> -> vector<8x128xf32>
    %c0_30 = arith.constant 0 : index
    %c0_31 = arith.constant 0 : index
    %100 = vector.load %arg7[%c0_30, %c0_31] : memref<1x128xf32, #tpu.memory_space<vmem>>, vector<1x128xf32>
    %101 = vector.broadcast %100 : vector<1x128xf32> to vector<8x128xf32>
    %102 = arith.addf %99, %101 : vector<8x128xf32>
    %cst_32 = arith.constant 0.000000e+00 : f32
    %103 = vector.broadcast %cst_32 : f32 to vector<8x128xf32>
    %104 = arith.maximumf %102, %103 : vector<8x128xf32>
    %105 = arith.truncf %104 : vector<8x128xf32> to vector<8x128xbf16>
    %c0_33 = arith.constant 0 : index
    %c0_34 = arith.constant 0 : index
    %106 = vector.load %arg8[%c0_33, %c0_34] : memref<128x32xbf16, #tpu.memory_space<vmem>>, vector<128x32xbf16>
    %cst_35 = arith.constant dense<0.000000e+00> : vector<8x32xf32>
    %107 = tpu.matmul %105, %106, %cst_35 {dimension_numbers = #tpu.dot_dimension_numbers<[1], [0], [0], [1], [0, 0, 1, 1], [], []>} : vector<8x128xbf16>, vector<128x32xbf16>, vector<8x32xf32> -> vector<8x32xf32>
    %c0_36 = arith.constant 0 : index
    %c0_37 = arith.constant 0 : index
    %108 = vector.load %arg9[%c0_36, %c0_37] : memref<1x32xf32, #tpu.memory_space<vmem>>, vector<1x32xf32>
    %109 = vector.broadcast %108 : vector<1x32xf32> to vector<8x32xf32>
    %110 = arith.addf %107, %109 : vector<8x32xf32>
    %111 = arith.addf %96, %110 : vector<8x32xf32>
    %112 = vector.shape_cast %111 : vector<8x32xf32> to vector<1x8x32xf32>
    %c0_38 = arith.constant 0 : index
    %c0_39 = arith.constant 0 : index
    %c0_40 = arith.constant 0 : index
    %113 = vector.load %arg10[%c0_38, %c0_39, %c0_40] : memref<1x8x32xf32, #tpu.memory_space<vmem>>, vector<1x8x32xf32>
    tpu.vector_store %arg10[%c0_38, %c0_39, %c0_40], %112 {strides = array<i32>} : memref<1x8x32xf32, #tpu.memory_space<vmem>>, vector<1x8x32xf32>,
    return
  }
  func.func @transform_0(%arg0: i32) -> (i32, i32, i32) {
    %c0_i32 = arith.constant 0 : i32
    %c0_i32_0 = arith.constant 0 : i32
    %c0_i32_1 = arith.constant 0 : i32
    return %arg0, %c0_i32, %c0_i32_0 : i32, i32, i32
  }
  func.func @transform_1(%arg0: i32) -> (i32, i32) {
    %c0_i32 = arith.constant 0 : i32
    %c0_i32_0 = arith.constant 0 : i32
    %c0_i32_1 = arith.constant 0 : i32
    return %c0_i32, %c0_i32_0 : i32, i32
  }
  func.func @transform_2(%arg0: i32) -> (i32, i32) {
    %c0_i32 = arith.constant 0 : i32
    %c0_i32_0 = arith.constant 0 : i32
    %c0_i32_1 = arith.constant 0 : i32
    return %c0_i32, %c0_i32_0 : i32, i32
  }
  func.func @transform_3(%arg0: i32) -> (i32, i32) {
    %c0_i32 = arith.constant 0 : i32
    %c0_i32_0 = arith.constant 0 : i32
    %c0_i32_1 = arith.constant 0 : i32
    return %c0_i32, %c0_i32_0 : i32, i32
  }
  func.func @transform_4(%arg0: i32) -> (i32, i32) {
    %c0_i32 = arith.constant 0 : i32
    %c0_i32_0 = arith.constant 0 : i32
    %c0_i32_1 = arith.constant 0 : i32
    return %c0_i32, %c0_i32_0 : i32, i32
  }
  func.func @transform_5(%arg0: i32) -> (i32, i32) {
    %c0_i32 = arith.constant 0 : i32
    %c0_i32_0 = arith.constant 0 : i32
    %c0_i32_1 = arith.constant 0 : i32
    return %c0_i32, %c0_i32_0 : i32, i32
  }
  func.func @transform_6(%arg0: i32) -> (i32, i32) {
    %c0_i32 = arith.constant 0 : i32
    %c0_i32_0 = arith.constant 0 : i32
    %c0_i32_1 = arith.constant 0 : i32
    return %c0_i32, %c0_i32_0 : i32, i32
  }
  func.func @transform_7(%arg0: i32) -> (i32, i32) {
    %c0_i32 = arith.constant 0 : i32
    %c0_i32_0 = arith.constant 0 : i32
    %c0_i32_1 = arith.constant 0 : i32
    return %c0_i32, %c0_i32_0 : i32, i32
  }
  func.func @transform_8(%arg0: i32) -> (i32, i32) {
    %c0_i32 = arith.constant 0 : i32
    %c0_i32_0 = arith.constant 0 : i32
    %c0_i32_1 = arith.constant 0 : i32
    return %c0_i32, %c0_i32_0 : i32, i32
  }
  func.func @transform_9(%arg0: i32) -> (i32, i32, i32) {
    %c0_i32 = arith.constant 0 : i32
    %c0_i32_0 = arith.constant 0 : i32
    %c0_i32_1 = arith.constant 0 : i32
    return %arg0, %c0_i32, %c0_i32_0 : i32, i32, i32
  }
}

</mosaic_0001>

<bundles_post_ra>
// kernel: tpu_custom_call.1
= control target key start
LH: loop header
LB: loop body
LE: loop exit
PB: predicated region body
PF: predicated region fallthrough
CT: control target
= control target key end

     0   :  { %14 = vsyncpa [#allocation3], 0  ;;  %s1338_s0 = inlined_call_operand.vmem [shape: f32[2,8,32], index: 0, kind: input, shape index: {}]   ;;  %s1339_s1 = inlined_call_operand.vmem [shape: bf16[32,96], index: 1, kind: input, shape index: {}]   ;;  %s1340_s2 = inlined_call_operand.vmem [shape: f32[1,96], index: 2, kind: input, shape index: {}]   ;;  %s1341_s3 = inlined_call_operand.vmem [shape: bf16[32,32], index: 3, kind: input, shape index: {}]   ;;  %s1342_s4 = inlined_call_operand.vmem [shape: f32[1,32], index: 4, kind: input, shape index: {}]   ;;  %s1343_s5 = inlined_call_operand.vmem [shape: bf16[32,128], index: 5, kind: input, shape index: {}]   ;;  %s1344_s6 = inlined_call_operand.vmem [shape: f32[1,128], index: 6, kind: input, shape index: {}]   ;;  %s1345_s7 = inlined_call_operand.vmem [shape: bf16[128,32], index: 7, kind: input, shape index: {}]   ;;  %s1346_s8 = inlined_call_operand.vmem [shape: f32[1,32], index: 8, kind: input, shape index: {}]   ;;  %s1347_s9 = inlined_call_operand.hbm [shape: f32[2,8,32], index: 9, kind: output, shape index: {}]  }
   0x1   :  { %16 = vsyncpa [#allocation3 + $0x1], 0  ;;  %s1149_s30 = smov 0   ;;  %s1151_s10 = smov 0  }
   0x2   :  { %s1153_s11 = smov 0   ;;  %s1155_s12 = smov 0  }
   0x3 LB: > { %s1170_s13 = sadd.s32 4294967295, %s1083_s12   ;;  %s857_s14 = sadd.s32 4294967294, %s1083_s12   ;;  %s1083_s12 = sphi %s1155_s12, %s1353_s12   ;;  %s1079_s11 = sphi %s1153_s11, %s1352_s11   ;;  %s1075_s10 = sphi %s1151_s10, %s1351_s10   ;;  %s1071_s30 = sphi %s1149_s30, %s1350_s30  }
   0x4   : > { %s1174_s15 = sadd.s32 1, %s1083_s12   ;;  %s223_s16 = sadd.s32 1, %s1079_s11 }
   0x5   : > { %s220_s17 = ssub.s32 %s1083_s12, %s1174_s15  ;;  %p233_p0 = scmp.ne.s32.totalorder %s1079_s11, %s1075_s10 }
   0x6   : > { %p221_p1 = scmp.eq.s32.totalorder %s220_s17, 0  ;;  %p234_p2 = scmp.eq.s32.totalorder %s1170_s13, 1 }
   0x7   : > { %p239_p3 = scmp.ne.s32.totalorder %s1075_s10, %s1071_s30  ;;  %p240_p4 = scmp.eq.s32.totalorder %s857_s14, 1 }
   0x8   : > { %s1185_s18 = scalar_select %p221_p1, %s1079_s11, %s223_s16  }
   0x9   : > { %p1187_p5 = por %p234_p2, %p233_p0  ;;  %p1191_p6 = por %p240_p4, %p239_p3 }
   0xa   : > { %p860_p7 = scmp.ge.s32.totalorder %s1083_s12, 1  ;;  %p289_p8 = scmp.lt.s32.totalorder %s1083_s12, 3 }
   0xc   : > { %p290_p9 = pnand %p860_p7, %p289_p8 }
   0xd   : > { %p324_p10 = scmp.lt.s32.totalorder (!%p290_p9), %s1170_s13, 1  ;;  %s1085_s17 = smov (!%p290_p9), 120  }
   0xe   : > { %293 = sbr.rel (%p290_p9) target bundleno = 1495 (0x5d7), region = 56  ;;  %s1086_s21 = smov (!%p290_p9), 64  }
   0xf   : > { %s1087_s22 = smov (!%p290_p9), 96   ;;  %s1088_s23 = smov (!%p290_p9), 72  }
  0x10   : > { %s1089_s24 = smov (!%p290_p9), 88   ;;  %s1092_s27 = smov (!%p290_p9), 112  }
  0x11   : > { %s1093_s28 = smov (!%p290_p9), 56   ;;  %s1095_s14 = smov (!%p290_p9), 48  }
  0x12   : > { %s1096_s16 = smov (!%p290_p9), 16  }
  0x13   : > { %v935_v0 = vld [vmem:[%s1339_s1 + $0x8] sm:$0xff]  ;;  %v934_v1 = vld [vmem:[%s1339_s1] sm:$0xff]  ;;  %s325_s25 = scalar_select %p324_p10, %s1170_s13, 1  ;;  %vm351_vm0 = vcmask 261120   ;;  %vm374_vm1 = vcmask 64512   ;;  %vm410_vm2 = vcmask 1043456  }
  0x14   : > { %361 = vmatpush.bf16.msra.mxu0 %v935_v0  ;;  %v1001_v4 = vld [vmem:[%s1340_s2] ss:$0 sm:$0xff]  ;;  %vm618_vm3 = vcmask 130048   ;;  %vm621_vm4 = vcmask 195584  }
  0x15   : > { %s862_s26 = sshll.u32 %s325_s25, 3  ;;  %s1090_s25 = smov 80  }
  0x16   : > { %s327_s29 = scalar_lea.vmem %s1338_s0, %s862_s26  ;;  %s1091_s26 = smov 104  }
  0x17   : > { %v1208_v2 = vld [vmem:[%s327_s29] sm:$0xff]  ;;  %s1094_s29 = smov 40  }
  0x18   : > { %362 = vmatpush.bf16.msra.mxu0 %v934_v1  ;;  %v330_v3 = vpack.c.bf16 %v1208_v2, %v1208_v2 }
  0x1b   : > { %871 = vmatmul.msk.bf16.vlgmr.msra.gmra.mxu0 %vm351_vm0, %v330_v3 }
  0x98   : > { %v364_v5 = vpop.f32.mrf.mxu0 }
  0x99   : > { %v365_v6 = vadd.f32 %v1001_v4, %v364_v5 }
  0x9b   : > { %v368_v7 = vpack.c.bf16 %v365_v6, %v365_v6 }
  0x9d   : > { %v370_v8 = vunpack.c.l.b16 %v368_v7 }
  0x9f   : > { %v1216_v9 = vpack.c.b16 %v370_v8, %v370_v8 }
  0xa0   : > { %v366_v10 = vpop.f32.mrf.mxu0 }
  0xa1   : > { %429 = vrot.lane.b32.xlu2 %v1216_v9, %s1085_s17  ;;  %405 = vrot.lane.b32.xlu1 %v1216_v9, %s1086_s21  ;;  %s1097_s17 = smov 8   ;;  %s1098_s21 = smov 24  }
  0xa2   : > { %372 = vrot.lane.b32.xlu0 %v1216_v9, %s1087_s22 }
  0xa9   : > { %545 = vrot.lane.b32.xlu2 %v1216_v9, %s1088_s23  ;;  %431 = vrot.lane.b32.xlu1 %v1216_v9, %s1089_s24 }
  0xb1   : > { %488 = vrot.lane.b32.xlu2 %v1216_v9, %s1090_s25  ;;  %543 = vrot.lane.b32.xlu1 %v1216_v9, %s1091_s26  ;;  %s321_s26 = sand.u32 1, %s1075_s10  }
  0xb9   : > { %486 = vrot.lane.b32.xlu1 %v1216_v9, %s1092_s27  ;;  %s861_s27 = sshll.u32 %s321_s26, 3 }
  0xba   : > { %s323_s22 = scalar_lea.vmem [#allocation2], %s861_s27  ;;  %s1041_s27 = scalar_lea.hbm %s1347_s9, 16 }
  0xbb   : > { %s795_s23 = sshll.u32 %s323_s22, 4  ;;  %s796_s23 = int_to_ptr.vmem [resolvable:$true] %s795_s23 }
  0xc1   : > { %463 = vrot.lane.b32.xlu1 %v1216_v9, %s1093_s28  ;;  %s931_s28 = sshll.u32 %s1170_s13, 3  ;;  %s783_s13 = scalar_lea.sflag [#allocation3], %s321_s26 }
  0xfb   : > { %v430_v11 = vpop.permute.xlu2 %429 }
 0x103   : > { %v546_v12 = vpop.permute.xlu2 %545 }
 0x104   : > { %v551_v13 = vsel %vm374_vm1, %v546_v12, 0 }
 0x105   : > { %560 = vmatpush.bf16.xpose.msra.mxu3 %v551_v13 }
 0x10b   : > { %v489_v14 = vpop.permute.xlu2 %488 }
 0x10c   : > { %v494_v15 = vsel %vm374_vm1, %v489_v14, 0 }
 0x10d   : > { %503 = vmatpush.bf16.xpose.msrb.mxu0 %v494_v15 }
 0x113   : > { %v406_v16 = vpop.permute.xlu1 %405 }
 0x114   : > { %v373_v17 = vpop.permute.xlu0 %372  ;;  %v412_v18 = vsel %vm410_vm2, %v406_v16, 0 }
 0x115   : > { %v379_v19 = vsel %vm374_vm1, %v373_v17, 0  ;;  %421 = vmatpush.bf16.msra.mxu2 %v412_v18 }
 0x116   : > { %388 = vmatpush.bf16.xpose.msra.mxu1 %v379_v19 }
 0x11b   : > { %v432_v20 = vpop.permute.xlu1 %431 }
 0x11c   : > { %v437_v21 = vsel %vm374_vm1, %v432_v20, 0 }
 0x11d   : > { %872 = vmatmul.msk.bf16.vlgmr.msra.gmra.mxu1 %vm374_vm1, %v368_v7  ;;  %446 = vmatpush.bf16.xpose.msrb.mxu2 %v437_v21 }
 0x123   : > { %v544_v22 = vpop.permute.xlu1 %543 }
 0x124   : > { %878 = vmatmul.msk.bf16.vlgmr.msra.gmra.mxu3 %vm374_vm1, %v544_v22 }
 0x12b   : > { %v487_v23 = vpop.permute.xlu1 %486 }
 0x12c   : > { %876 = vmatmul.msk.bf16.vlgmr.msrb.gmra.mxu0 %vm374_vm1, %v487_v23 }
 0x133   : > { %v464_v37 = vpop.permute.xlu1 %463 }
 0x134   : > { %v469_v39 = vsel %vm410_vm2, %v464_v37, 0 }
 0x19a   : > { %v390_v24 = vpop.f32.mrf.mxu1 }
 0x19b   : > { %v394_v25 = vsel %vm374_vm1, %v390_v24, -inf }
 0x19c   : > { %395 = vmax.xlane.f32.xlu0 %v394_v25 }
 0x1a2   : > { %v392_v26 = vpop.f32.mrf.mxu1 }
 0x1a7   : > { %v562_v27 = vpop.f32.mrf.mxu3 }
 0x1a8   : > { %v566_v28 = vsel %vm374_vm1, %v562_v27, -inf }
 0x1a9   : > { %567 = vmax.xlane.f32.xlu1 %v566_v28  ;;  %v505_v29 = vpop.f32.mrf.mxu0 }
 0x1aa   : > { %v509_v30 = vsel %vm374_vm1, %v505_v29, -inf }
 0x1ab   : > { %510 = vmax.xlane.f32.xlu0 %v509_v30  ;;  %v936_v30 = vld [vmem:[%s1341_s3] sm:$0xff] }
 0x1af   : > { %v564_v31 = vpop.f32.mrf.mxu3 }
 0x1b0   : > { %v939_v31 = vld [vmem:[%s1343_s5 + $0x8] sm:$0xff] }
 0x1b1   : > { %v507_v32 = vpop.f32.mrf.mxu0 }
 0x1b2   : > { %v938_v32 = vld [vmem:[%s1343_s5] sm:$0xff] }
 0x1bf   : > { %577 = vrot.lane.b32.xlu0 %v1216_v9, %s1094_s29 }
 0x20f   : > { %v396_v33 = vpop.xlane.xlu0 %395 }
 0x210   : > { %v397_v34 = vsub.f32 %v390_v24, %v396_v33 }
 0x212   : > { %v398_v35 = vmul.f32 1.442695, %v397_v34 }
 0x214   : > { %1005 = vpow2.f32 %v398_v35 }
 0x21a   : > { %v1006_v36 = vpop.eup %1005 }
 0x21b   : > { %v404_v38 = vpack.c.bf16 %v1006_v36, %v1006_v36  ;;  %v400_v47 = vsel %vm374_vm1, %v1006_v36, 0.0 }
 0x21c   : > { %v568_v53 = vpop.xlane.xlu1 %567 }
 0x21d   : > { %873 = vmatmul.msk.bf16.vlgmr.msra.gmra.mxu2 %vm374_vm1, %v404_v38  ;;  %v569_v54 = vsub.f32 %v562_v27, %v568_v53 }
 0x21e   : > { %478 = vmatpush.bf16.msra.mxu2 %v469_v39  ;;  %v511_v40 = vpop.xlane.xlu0 %510 }
 0x21f   : > { %v512_v41 = vsub.f32 %v505_v29, %v511_v40  ;;  %v570_v55 = vmul.f32 1.442695, %v569_v54  ;;  %v937_v29 = vld [vmem:[%s1341_s3 + $0x8] sm:$0xff] }
 0x220   : > { %652 = vmatpush.bf16.msra.mxu0 %v937_v29 }
 0x221   : > { %v513_v42 = vmul.f32 1.442695, %v512_v41 }
 0x223   : > { %1007 = vpow2.f32 %v513_v42 }
 0x224   : > { %1009 = vpow2.f32 %v570_v55  ;;  %653 = vmatpush.bf16.msra.mxu0 %v936_v30  ;;  %v941_v55 = vld [vmem:[%s1345_s7 + $0x8] sm:$0xff] }
 0x229   : > { %v1008_v43 = vpop.eup %1007 }
 0x22a   : > { %v515_v44 = vsel %vm374_vm1, %v1008_v43, 0.0  ;;  %v1010_v56 = vpop.eup %1009  ;;  %v519_v0 = vpack.c.bf16 %v1008_v43, %v1008_v43  ;;  %v947_v43 = vld [vmem:[%s1345_s7 + $0x38] sm:$0xff] }
 0x22b   : > { %516 = vadd.xlane.f32.xlu1 %v515_v44  ;;  %v572_v57 = vsel %vm374_vm1, %v1010_v56, 0.0  ;;  %v576_v4 = vpack.c.bf16 %v1010_v56, %v1010_v56  ;;  %767 = vmatpush.bf16.msrb.mxu3 %v947_v43  ;;  %v946_v44 = vld [vmem:[%s1345_s7 + $0x30] sm:$0xff]  ;;  %v940_v56 = vld [vmem:[%s1345_s7] sm:$0xff] }
 0x22d   : > { %874 = vmatmul.msk.bf16.vlgmr.msrb.gmra.mxu2 %vm374_vm1, %v430_v11 }
 0x22f   : > { %768 = vmatpush.bf16.msrb.mxu3 %v946_v44 }
 0x231   : > { %v578_v45 = vpop.permute.xlu0 %577 }
 0x232   : > { %v583_v46 = vsel %vm410_vm2, %v578_v45, 0  ;;  %v945_v45 = vld [vmem:[%s1345_s7 + $0x28] sm:$0xff] }
 0x233   : > { %401 = vadd.xlane.f32.xlu1 %v400_v47  ;;  %592 = vmatpush.bf16.msrb.mxu2 %v583_v46  ;;  %v944_v46 = vld [vmem:[%s1345_s7 + $0x20] sm:$0xff]  ;;  %v943_v47 = vld [vmem:[%s1345_s7 + $0x18] sm:$0xff] }
 0x234   : > { %769 = vmatpush.bf16.msrb.mxu3 %v945_v45 }
 0x238   : > { %770 = vmatpush.bf16.msrb.mxu3 %v944_v46 }
 0x23c   : > { %771 = vmatpush.bf16.msrb.mxu3 %v943_v47 }
 0x29e   : > { %v517_v5 = vpop.xlane.xlu1 %516 }
 0x2a0   : > { %v1245_v48 = vpop.f32.mrf.mxu2 }
 0x2a6   : > { %v402_v33 = vpop.xlane.xlu1 %401 }
 0x2a8   : > { %v425_v49 = vpop.f32.mrf.mxu2 }
 0x2a9   : > { %v1002_v49 = vld [vmem:[%s1342_s4] ss:$0 sm:$0xff] }
 0x2b0   : > { %v448_v50 = vpop.f32.mrf.mxu2 }
 0x2b1   : > { %v452_v51 = vsel %vm374_vm1, %v448_v50, -inf }
 0x2b2   : > { %453 = vmax.xlane.f32.xlu2 %v452_v51 }
 0x2b8   : > { %v450_v52 = vpop.f32.mrf.mxu2 }
 0x2ca   : > { %520 = vrot.lane.b32.xlu2 %v1216_v9, %s1095_s14 }
 0x2f3   : > { %573 = vadd.xlane.f32.xlu2 %v572_v57  ;;  %v1003_v57 = vld [vmem:[%s1344_s6] ss:$0 sm:$0xff] }
 0x325   : > { %v454_v58 = vpop.xlane.xlu2 %453 }
 0x326   : > { %v455_v59 = vsub.f32 %v448_v50, %v454_v58 }
 0x328   : > { %v456_v60 = vmul.f32 1.442695, %v455_v59 }
 0x32a   : > { %1011 = vpow2.f32 %v456_v60 }
 0x32b   : > { %1013 = vrcp.f32 %v517_v5 }
 0x32d   : > { %v521_v61 = vpop.permute.xlu2 %520 }
 0x32e   : > { %v526_v62 = vsel %vm410_vm2, %v521_v61, 0 }
 0x32f   : > { %535 = vmatpush.bf16.msrb.mxu1 %v526_v62  ;;  %v1004_v62 = vld [vmem:[%s1346_s8] ss:$0 sm:$0xff] }
 0x330   : > { %v1012_v63 = vpop.eup %1011 }
 0x331   : > { %v462_v1 = vpack.c.bf16 %v1012_v63, %v1012_v63  ;;  %v458_v3 = vsel %vm374_vm1, %v1012_v63, 0.0  ;;  %v1014_v7 = vpop.eup %1013 }
 0x332   : > { %459 = vadd.xlane.f32.xlu0 %v458_v3  ;;  %877 = vmatmul.msk.bf16.vlgmr.msrb.gmra.mxu1 %vm374_vm1, %v519_v0 }
 0x333   : > { %875 = vmatmul.msk.bf16.vlgmr.msra.gmra.mxu2 %vm374_vm1, %v462_v1  ;;  %690 = vmatpush.bf16.msra.mxu1 %v939_v31 }
 0x337   : > { %691 = vmatpush.bf16.msra.mxu1 %v938_v32 }
 0x343   : > { %879 = vmatmul.msk.bf16.vlgmr.msrb.gmra.mxu2 %vm374_vm1, %v576_v4 }
 0x366   : > { %v574_v19 = vpop.xlane.xlu2 %573 }
 0x3a5   : > { %v460_v6 = vpop.xlane.xlu0 %459 }
 0x3a6   : > { %1015 = vrcp.f32 %v460_v6 }
 0x3a7   : > { %1017 = vrcp.f32 %v574_v19 }
 0x3a8   : > { %1019 = vrcp.f32 %v402_v33 }
 0x3ac   : > { %v1016_v12 = vpop.eup %1015 }
 0x3ad   : > { %v1018_v22 = vpop.eup %1017 }
 0x3ae   : > { %v1020_v34 = vpop.eup %1019 }
 0x3af   : > { %v537_v8 = vpop.f32.mrf.mxu1  ;;  %v427_v35 = vmul.f32 %v1020_v34, %v1245_v48  ;;  %v942_v48 = vld [vmem:[%s1345_s7 + $0x10] sm:$0xff] }
 0x3b0   : > { %v541_v9 = vmul.f32 %v1014_v7, %v537_v8  ;;  %772 = vmatpush.bf16.msrb.mxu3 %v942_v48 }
 0x3b1   : > { %v428_v37 = vpack.c.bf16 %v427_v35, %v427_v35 }
 0x3b2   : > { %v542_v10 = vpack.c.bf16 %v541_v9, %v541_v9 }
 0x3b4   : > { %v606_v11 = vunpack.c.l.b16 %v542_v10  ;;  %773 = vmatpush.bf16.msrb.mxu3 %v941_v55 }
 0x3b6   : > { %v607_v13 = vpack.c.b16 %v606_v11, %v606_v11  ;;  %v480_v14 = vpop.f32.mrf.mxu2 }
 0x3b7   : > { %v484_v15 = vmul.f32 %v1016_v12, %v480_v14  ;;  %v539_v16 = vpop.f32.mrf.mxu1 }
 0x3b8   : > { %608 = vrot.lane.b32.xlu0 %v607_v13, %s1096_s16  ;;  %774 = vmatpush.bf16.msrb.mxu3 %v940_v56 }
 0x3b9   : > { %v485_v17 = vpack.c.bf16 %v484_v15, %v484_v15 }
 0x3bb   : > { %v601_v18 = vunpack.c.l.b16 %v485_v17 }
 0x3bd   : > { %v602_v20 = vpack.c.b16 %v601_v18, %v601_v18 }
 0x3be   : > { %v482_v21 = vpop.f32.mrf.mxu2 }
 0x3bf   : > { %603 = vrot.lane.b32.xlu1 %v602_v20, %s1097_s17 }
 0x3c6   : > { %v594_v23 = vpop.f32.mrf.mxu2 }
 0x3c7   : > { %v598_v24 = vmul.f32 %v1018_v22, %v594_v23 }
 0x3c9   : > { %v599_v25 = vpack.c.bf16 %v598_v24, %v598_v24 }
 0x3cb   : > { %v611_v26 = vunpack.c.l.b16 %v599_v25 }
 0x3cd   : > { %v612_v27 = vpack.c.b16 %v611_v26, %v611_v26 }
 0x3ce   : > { %v596_v28 = vpop.f32.mrf.mxu2 }
 0x3cf   : > { %613 = vrot.lane.b32.xlu1 %v612_v27, %s1098_s21  ;;  %s793_s21 = scalar_lea.hbm %s1347_s9, %s931_s28 }
 0x3d0   : > { %s797_s24 = sshll.u32 %s793_s21, 4  ;;  %s798_s24 = int_to_ptr.hbm [resolvable:$true] %s797_s24 }
 0x3d1   : > { %s1035_s25 = sshra.s32 %s798_s24, 4  ;;  %s1036_s25 = int_to_ptr.hbm [resolvable:$true] %s1035_s25 }
 0x3d2   : > { %s1037_s29 = scalar_lea.hbm %s1036_s25, 8  ;;  %p1042_p0 = scmp.lt.s32.totalorder %s1036_s25, %s1347_s9 }
 0x3d3   : > { %p1038_p11 = scmp.ne.s32.totalorder %s1036_s25, %s1037_s29  ;;  %p1043_p1 = scmp.lt.s32.totalorder %s1041_s27, %s1037_s29 }
 0x3d5   : > { %p1039_p12 = pnand %p1038_p11, %p1187_p5  ;;  %p1044_p2 = por %p1043_p1, %p1042_p0 }
 0x3d7   : > { %p1040_p13 = pneg %p1039_p12 }
 0x3d9   : > { %p1045_p3 = pnand %p1044_p2, %p1040_p13 }
 0x42a   : > { %v609_v39 = vpop.permute.xlu0 %608 }
 0x431   : > { %v604_v36 = vpop.permute.xlu1 %603 }
 0x432   : > { %v617_v38 = vsel %vm374_vm1, %v428_v37, %v604_v36 }
 0x433   : > { %v620_v41 = vsel %vm618_vm3, %v617_v38, %v609_v39 }
 0x441   : > { %v614_v40 = vpop.permute.xlu1 %613 }
 0x442   : > { %v623_v42 = vsel %vm621_vm4, %v620_v41, %v614_v40 }
 0x443   : > { %888 = vmatmul.msk.bf16.vlgmr.msra.gmra.mxu0 %vm351_vm0, %v623_v42 }
 0x4c0   : > { %v655_v50 = vpop.f32.mrf.mxu0 }
 0x4c1   : > { %v656_v51 = vadd.f32 %v1002_v49, %v655_v50 }
 0x4c3   : > { %v659_v52 = vadd.f32 %v656_v51, %v1208_v2 }
 0x4c5   : > { %v660_v53 = vpack.c.bf16 %v659_v52, %v659_v52 }
 0x4c7   : > { %897 = vmatmul.msk.bf16.vlgmr.msra.gmra.mxu1 %vm351_vm0, %v660_v53 }
 0x4c8   : > { %v657_v54 = vpop.f32.mrf.mxu0 }
 0x544   : > { %v693_v2 = vpop.f32.mrf.mxu1 }
 0x545   : > { %v694_v58 = vadd.f32 %v1003_v57, %v693_v2 }
 0x547   : > { %v697_v59 = vmax.f32 %v694_v58, 0.0 }
 0x549   : > { %v698_v60 = vpack.c.bf16 %v697_v59, %v697_v59 }
 0x54b   : > { %775 = vmatmul.bf16.vlgmr.msrb.gmra.mxu3 %v698_v60 }
 0x54c   : > { %v695_v61 = vpop.f32.mrf.mxu1 }
 0x5ce   : > { %v776_v63 = vpop.f32.mrf.mxu3 }
 0x5cf   : > { %v777_v0 = vadd.f32 %v1004_v62, %v776_v63 }
 0x5d1   : > { %v780_v1 = vadd.f32 %v777_v0, %v659_v52 }
 0x5d3   : > { %781 = vst.msk [vmem:[%s323_s22] sm:$0xff] %vm351_vm0, %v780_v1 }
 0x5d4   : > { %1048 = shalt.err (!%p1045_p3)
}
 0x5d5   : > { %948 = dma.vmem_to_hbm [thread:$0]  (%p1187_p5), %s796_s23, 128, %s798_s24, %s783_s13  }
 0x5d6   : > { %v778_v3 = vpop.f32.mrf.mxu3 }
 0x5d7 PF: > { %p954_p4 = scmp.ge.s32.totalorder %s1083_s12, 2  ;;  %s809_s26 = sand.u32 1, %s1071_s30  }
 0x5d8   : > { %s810_s21 = scalar_lea.sflag [#allocation3], %s809_s26 }
 0x5d9   : > { %p951_p7 = pnand %p954_p4, %p1191_p6 }
 0x5db   : > { %p952_p8 = pneg %p951_p7 }
 0x5dd   : > { %1066 = dma.done.wait (%p952_p8), %s810_s21, 128  }
 0x5de   : > { %1068 = vsyncadd (%p952_p8), %s810_s21, 4294967168  ;;  %p19_p9 = scmp.ge.s32.totalorder %s1174_s15, 4   ;;  %s1350_s30 = smov %s1075_s10 }
 0x5df   : > { %s1351_s10 = smov %s1079_s11  ;;  %s1352_s11 = smov %s1185_s18 }
 0x5e0   : > { %s1353_s12 = smov %s1174_s15  ;;  %21 = sbr.rel (!%p19_p9) target bundleno = 3 (0x3), region = 91 }
 0x5e5   :  { %816 = vsyncpa [#allocation3], 1 }
 0x5e6   :  { %818 = vsyncpa [#allocation3 + $0x1], 1 }

</bundles_post_ra>
